<compile_context>
chip_gen: v7x
topology: tpu7x:2x2x1
jax: 0.10.0
libtpu: 0.0.40
codegen_flags: <defaults>
</compile_context>

<pallas_src>
import functools

import jax
import jax.numpy as jnp
from jax.experimental import pallas as pl
from jax.experimental.pallas import tpu as pltpu

factors = [1, 1, 1, 1, 1 / 2, 1 / 4, 1 / 8, 1 / 16, 1 / 32]
LRELU_SLOPE = 0.2
PN_EPS = 1e-8

VMEM = pltpu.MemorySpace.VMEM
_MAX_TILE_M = 512                     # rows per grid step (multiple of 8)
_VMEM_LIMIT = 32 * 1024 * 1024        # safe on v5e / v6e / v7x scoped VMEM


def _round_up(x, m):
    return (x + m - 1) // m * m


# ------------------------- geometry / layout glue ---------------------------

def _geom(n, h, w):
    """Static geometry of the guarded-flat layout at resolution (h, w)."""
    hp, wp = h + 2, w + 2
    m_act = n * hp * wp                        # rows of the padded image stack
    tile = min(_MAX_TILE_M, _round_up(m_act, 8))
    # gpad >= tile + wp + 1 guarantees every tile touching real pixels only
    # reads in-bounds rows, and every clamped tile is fully masked.
    gpad = _round_up(tile + wp + 1, 8)
    mg = _round_up(m_act + 2 * gpad, tile)     # total rows, multiple of tile
    return dict(h=h, w=w, hp=hp, wp=wp, m_act=m_act, tile=tile,
                gpad=gpad, mg=mg)


def _make_mask(n, geom):
    """(mg, 1) f32 mask: 1.0 on interior pixels, 0.0 on guard/border rows."""
    hp, wp, h, w = geom['hp'], geom['wp'], geom['h'], geom['w']
    gpad, m_act, mg = geom['gpad'], geom['m_act'], geom['mg']
    r = jnp.arange(mg, dtype=jnp.int32) - gpad
    valid = (r >= 0) & (r < m_act)
    rr = jnp.where(valid, r, 0)
    p = rr % (hp * wp)
    i = p // wp
    j = p % wp
    interior = valid & (i >= 1) & (i <= h) & (j >= 1) & (j <= w)
    return interior.astype(jnp.float32)[:, None]


def _to_guarded(x_nhwc, geom, dtype=jnp.bfloat16):
    n = x_nhwc.shape[0]
    c = x_nhwc.shape[-1]
    xp = jnp.pad(x_nhwc, ((0, 0), (1, 1), (1, 1), (0, 0))).astype(dtype)
    flat = xp.reshape(n * geom['hp'] * geom['wp'], c)
    bot = geom['mg'] - geom['gpad'] - geom['m_act']
    return jnp.pad(flat, ((geom['gpad'], bot), (0, 0)))


def _from_guarded(xg, n, geom):
    flat = xg[geom['gpad']:geom['gpad'] + geom['m_act']]
    img = flat.reshape(n, geom['hp'], geom['wp'], -1)
    return img[:, 1:1 + geom['h'], 1:1 + geom['w'], :]


def _upsample2x_to_guarded(h_guarded, n, geom_src, geom_dst):
    # TODO(synk): nearest-neighbor 2x upsample + re-pad is done in XLA (one
    # fused materialization); fusing it into the conv's tap gather would need
    # a sublane gather per tap and is left out for lowering robustness.
    x = _from_guarded(h_guarded, n, geom_src)
    x = jnp.repeat(jnp.repeat(x, 2, axis=1), 2, axis=2)
    return _to_guarded(x, geom_dst)


# ------------------------------ Pallas kernels -------------------------------

def _initial_kernel(z_ref, w_ref, b_ref, o_ref):
    """Fused PixelNorm(z) -> ConvT(4x4)-as-GEMM -> bias -> LeakyReLU."""
    z = z_ref[...].astype(jnp.float32)
    z = z * jax.lax.rsqrt(jnp.mean(z * z, axis=-1, keepdims=True) + PN_EPS)
    acc = jnp.dot(z.astype(w_ref.dtype), w_ref[...],
                  preferred_element_type=jnp.float32)
    acc = acc + b_ref[...]
    acc = jnp.where(acc >= 0.0, acc, LRELU_SLOPE * acc)
    o_ref[...] = acc.astype(o_ref.dtype)


def initial_stage(z, wt, bt):
    n = z.shape[0]
    cols = wt.shape[1]
    return pl.pallas_call(
        _initial_kernel,
        out_shape=jax.ShapeDtypeStruct((n, cols), jnp.bfloat16),
        in_specs=[pl.BlockSpec(memory_space=VMEM)] * 3,
        out_specs=pl.BlockSpec(memory_space=VMEM),
    )(z, wt, bt.reshape(1, cols))


def _conv3x3_kernel(x_ref, w_ref, b_ref, mask_ref, o_ref, *,
                    tile_m, wp, gpad, m_act, mg_in, do_pixelnorm):
    m = pl.program_id(0)
    base = m * tile_m
    # Tiles entirely inside the zero guard: write zeros, skip the 9 GEMMs.
    is_guard = jnp.logical_or(base + tile_m <= gpad, base >= gpad + m_act)

    @pl.when(is_guard)
    def _():
        o_ref[...] = jnp.zeros_like(o_ref)

    @pl.when(jnp.logical_not(is_guard))
    def _():
        cout = o_ref.shape[-1]
        acc = jnp.zeros((tile_m, cout), jnp.float32)
        # 3x3 conv as nine shifted bf16 GEMMs accumulated in f32 registers
        # (eliminates the 9x im2col slab in HBM).
        for t in range(9):
            ky, kx = t // 3, t % 3
            d = (ky - 1) * wp + (kx - 1)
            start = jnp.clip(base + d, 0, mg_in - tile_m)   # always in-bounds
            xs = x_ref[pl.ds(start, tile_m), :]
            acc = acc + jnp.dot(xs, w_ref[t],
                                preferred_element_type=jnp.float32)
        acc = acc + b_ref[...]
        acc = jnp.where(acc >= 0.0, acc, LRELU_SLOPE * acc)
        if do_pixelnorm:
            # mean over the true channel count (no padded lanes involved)
            acc = acc * jax.lax.rsqrt(
                jnp.mean(acc * acc, axis=-1, keepdims=True) + PN_EPS)
        acc = acc * mask_ref[...]      # re-zero guard + padding-border rows
        o_ref[...] = acc.astype(o_ref.dtype)


def conv3x3_guarded(xg, mask, p, geom, *, do_pixelnorm=True):
    mg, cin = xg.shape
    cout = p['w'].shape[-1]
    tile = geom['tile']
    ngrid = mg // tile
    kern = functools.partial(
        _conv3x3_kernel, tile_m=tile, wp=geom['wp'], gpad=geom['gpad'],
        m_act=geom['m_act'], mg_in=mg, do_pixelnorm=do_pixelnorm)
    return pl.pallas_call(
        kern,
        out_shape=jax.ShapeDtypeStruct((mg, cout), jnp.bfloat16),
        grid=(ngrid,),
        in_specs=[
            pl.BlockSpec((mg, cin), lambda m: (0, 0)),        # resident input
            pl.BlockSpec((9, cin, cout), lambda m: (0, 0, 0)),
            pl.BlockSpec((1, cout), lambda m: (0, 0)),
            pl.BlockSpec((tile, 1), lambda m: (m, 0)),
        ],
        out_specs=pl.BlockSpec((tile, cout), lambda m: (m, 0)),
        compiler_params=pltpu.CompilerParams(
            dimension_semantics=("parallel",),
            vmem_limit_bytes=_VMEM_LIMIT),
    )(xg, p['w'], p['b'].reshape(1, cout), mask)


def _rgb_kernel(x_ref, w_ref, b_ref, o_ref):
    o_ref[...] = (jnp.dot(x_ref[...], w_ref[...],
                          preferred_element_type=jnp.float32) + b_ref[...])


def rgb_conv_guarded(xg, p, geom):
    mg, cin = xg.shape
    cout = p['w'].shape[-1]
    tile = geom['tile']
    return pl.pallas_call(
        _rgb_kernel,
        out_shape=jax.ShapeDtypeStruct((mg, cout), jnp.float32),
        grid=(mg // tile,),
        in_specs=[
            pl.BlockSpec((tile, cin), lambda m: (m, 0)),
            pl.BlockSpec((cin, cout), lambda m: (0, 0)),
            pl.BlockSpec((1, cout), lambda m: (0, 0)),
        ],
        out_specs=pl.BlockSpec((tile, cout), lambda m: (m, 0)),
        compiler_params=pltpu.CompilerParams(
            dimension_semantics=("parallel",),
            vmem_limit_bytes=_VMEM_LIMIT),
    )(xg, p['w'], p['b'].reshape(1, cout))


def _tail_kernel(alpha_ref, up_ref, h_ref, w1_ref, b1_ref, w2_ref, b2_ref,
                 o_ref):
    """Fused: rgb_prev(upscaled), rgb_new(h), fade-in, tanh."""
    a = alpha_ref[...]                                   # (1, 1) broadcast
    r1 = jnp.dot(up_ref[...], w1_ref[...],
                 preferred_element_type=jnp.float32) + b1_ref[...]
    r2 = jnp.dot(h_ref[...], w2_ref[...],
                 preferred_element_type=jnp.float32) + b2_ref[...]
    o_ref[...] = jnp.tanh((1.0 - a) * r1 + a * r2)


def tail_fused(up_g, h_g, rgb_prev, rgb_new, alpha, geom):
    mg, c1 = up_g.shape
    c2 = h_g.shape[1]
    cimg = rgb_new['w'].shape[-1]
    tile = geom['tile']
    alpha_arr = jnp.asarray(alpha, jnp.float32).reshape(1, 1)
    return pl.pallas_call(
        _tail_kernel,
        out_shape=jax.ShapeDtypeStruct((mg, cimg), jnp.float32),
        grid=(mg // tile,),
        in_specs=[
            pl.BlockSpec((1, 1), lambda m: (0, 0)),
            pl.BlockSpec((tile, c1), lambda m: (m, 0)),
            pl.BlockSpec((tile, c2), lambda m: (m, 0)),
            pl.BlockSpec((c1, cimg), lambda m: (0, 0)),
            pl.BlockSpec((1, cimg), lambda m: (0, 0)),
            pl.BlockSpec((c2, cimg), lambda m: (0, 0)),
            pl.BlockSpec((1, cimg), lambda m: (0, 0)),
        ],
        out_specs=pl.BlockSpec((tile, cimg), lambda m: (m, 0)),
        compiler_params=pltpu.CompilerParams(
            dimension_semantics=("parallel",),
            vmem_limit_bytes=_VMEM_LIMIT),
    )(alpha_arr, up_g, h_g,
      rgb_prev['w'], rgb_prev['b'].reshape(1, cimg),
      rgb_new['w'], rgb_new['b'].reshape(1, cimg))


# -------------------------------- parameters --------------------------------

def _ws_scale(in_c, k):
    return (2.0 / (in_c * k * k)) ** 0.5   # WSconv2d equalized-LR scale, gain=2


def _make_conv3x3_params(key, in_c, out_c):
    w = jax.random.normal(key, (out_c, in_c, 3, 3), jnp.float32) * _ws_scale(in_c, 3)
    b = jnp.zeros((out_c,), jnp.float32)
    # (Cout,Cin,ky,kx) -> (ky,kx,Cin,Cout) -> (9, Cin, Cout), tap t = ky*3+kx
    w9 = jnp.transpose(w, (2, 3, 1, 0)).reshape(9, in_c, out_c)
    return {'w': w9.astype(jnp.bfloat16), 'b': b}


def _make_conv1x1_params(key, in_c, out_c):
    w = jax.random.normal(key, (out_c, in_c, 1, 1), jnp.float32) * _ws_scale(in_c, 1)
    b = jnp.zeros((out_c,), jnp.float32)
    return {'w': w[:, :, 0, 0].T.astype(jnp.bfloat16), 'b': b}


def init_generator_params(key, z_dim, in_channels, img_channels=3):
    n_blocks = len(factors) - 1
    keys = jax.random.split(key, 4 + 3 * n_blocks)
    ki = iter(keys)
    params = {}

    # initial ConvTranspose2d(z_dim, C, 4, 1, 0) on a 1x1 input == GEMM
    wt = jax.random.normal(next(ki), (z_dim, in_channels, 4, 4), jnp.float32) * 0.05
    bt = jnp.zeros((in_channels,), jnp.float32)
    params['convT_w'] = jnp.transpose(wt, (0, 2, 3, 1)).reshape(
        z_dim, 16 * in_channels).astype(jnp.bfloat16)     # cols ordered (i,j,c)
    params['convT_b'] = jnp.tile(bt, 16)

    params['initial_conv'] = _make_conv3x3_params(next(ki), in_channels, in_channels)

    blocks = []
    for i in range(n_blocks):
        cin = int(in_channels * factors[i])
        cout = int(in_channels * factors[i + 1])
        blocks.append((_make_conv3x3_params(next(ki), cin, cout),
                       _make_conv3x3_params(next(ki), cout, cout)))
    params['blocks'] = blocks

    rgb = [_make_conv1x1_params(next(ki), in_channels, img_channels)]
    for i in range(n_blocks):
        cout = int(in_channels * factors[i + 1])
        rgb.append(_make_conv1x1_params(next(ki), cout, img_channels))
    params['rgb'] = rgb
    return params


# --------------------------------- forward ----------------------------------

def generator_forward(params, x_nchw, alpha, steps):
    """x_nchw: (N, z_dim, 1, 1) f32.  Returns NCHW image, matching PyTorch."""
    n, z_dim = x_nchw.shape[0], x_nchw.shape[1]
    c0 = params['convT_b'].shape[0] // 16

    # initial: PixelNorm -> ConvT(4x4) -> lrelu  (one fused kernel)
    z = x_nchw.reshape(n, z_dim)
    h0 = initial_stage(z, params['convT_w'], params['convT_b'])   # (n, 16*c0)

    geom = _geom(n, 4, 4)
    mask = _make_mask(n, geom)
    hg = _to_guarded(h0.reshape(n, 4, 4, c0), geom)
    # initial WSconv3x3 -> lrelu -> PixelNorm
    h = conv3x3_guarded(hg, mask, params['initial_conv'], geom)

    if steps == 0:
        rgb = rgb_conv_guarded(h, params['rgb'][0], geom)
        img = _from_guarded(rgb, n, geom)
        return jnp.transpose(img, (0, 3, 1, 2))

    upscaled = h
    res = 4
    for step in range(steps):
        res *= 2
        geom2 = _geom(n, res, res)
        mask2 = _make_mask(n, geom2)
        upscaled = _upsample2x_to_guarded(h, n, geom, geom2)
        b1, b2 = params['blocks'][step]
        t = conv3x3_guarded(upscaled, mask2, b1, geom2)
        h = conv3x3_guarded(t, mask2, b2, geom2)
        geom = geom2

    out_g = tail_fused(upscaled, h, params['rgb'][steps - 1],
                       params['rgb'][steps], alpha, geom)
    img = _from_guarded(out_g, n, geom)
    return jnp.transpose(img, (0, 3, 1, 2))


# ----------------------- pure-XLA reference (f32 path) ----------------------

def _ref_conv3x3(x, p, *, do_pixelnorm=True):
    n, h, w, _ = x.shape
    xp = jnp.pad(x, ((0, 0), (1, 1), (1, 1), (0, 0)))
    wt = p['w'].astype(jnp.float32)
    acc = jnp.zeros((n, h, w, wt.shape[-1]), jnp.float32)
    for t in range(9):
        ky, kx = t // 3, t % 3
        acc = acc + jnp.einsum('nhwc,cd->nhwd',
                               xp[:, ky:ky + h, kx:kx + w, :], wt[t])
    acc = acc + p['b']
    acc = jnp.where(acc >= 0.0, acc, LRELU_SLOPE * acc)
    if do_pixelnorm:
        acc = acc * jax.lax.rsqrt(
            jnp.mean(acc * acc, axis=-1, keepdims=True) + PN_EPS)
    return acc


def _ref_conv1x1(x, p):
    return jnp.einsum('nhwc,cd->nhwd', x, p['w'].astype(jnp.float32)) + p['b']


def reference_forward(params, x_nchw, alpha, steps):
    n, z_dim = x_nchw.shape[0], x_nchw.shape[1]
    c0 = params['convT_b'].shape[0] // 16
    z = x_nchw.reshape(n, z_dim)
    z = z * jax.lax.rsqrt(jnp.mean(z * z, axis=-1, keepdims=True) + PN_EPS)
    h = z @ params['convT_w'].astype(jnp.float32) + params['convT_b']
    h = jnp.where(h >= 0.0, h, LRELU_SLOPE * h)
    h = h.reshape(n, 4, 4, c0)
    h = _ref_conv3x3(h, params['initial_conv'])
    if steps == 0:
        return jnp.transpose(_ref_conv1x1(h, params['rgb'][0]), (0, 3, 1, 2))
    upscaled = h
    for step in range(steps):
        upscaled = jnp.repeat(jnp.repeat(h, 2, axis=1), 2, axis=2)
        b1, b2 = params['blocks'][step]
        t = _ref_conv3x3(upscaled, b1)
        h = _ref_conv3x3(t, b2)
    fu = _ref_conv1x1(upscaled, params['rgb'][steps - 1])
    fg = _ref_conv1x1(h, params['rgb'][steps])
    out = jnp.tanh((1.0 - alpha) * fu + alpha * fg)
    return jnp.transpose(out, (0, 3, 1, 2))


# ----------------------------------- main ------------------------------------

if __name__ == "__main__":
    key = jax.random.PRNGKey(0)
    k_params, k_x = jax.random.split(key)

    z_dim = 32
    in_channels = 32
    img_channels = 3
    batch = 2
    steps = 2          # output resolution = 4 * 2**steps = 16
    alpha = 0.5

    params = init_generator_params(k_params, z_dim, in_channels, img_channels)
    x = jax.random.normal(k_x, (batch, z_dim, 1, 1), jnp.float32)

    out = generator_forward(params, x, alpha, steps)
    out = jax.block_until_ready(out)

    expected_shape = (batch, img_channels, 4 * 2 ** steps, 4 * 2 ** steps)
    assert out.shape == expected_shape, (out.shape, expected_shape)
    assert bool(jnp.all(jnp.isfinite(out)))
    assert bool(jnp.all(jnp.abs(out) <= 1.0))   # tanh output range

    # numerical self-check vs a pure-XLA f32 reference (kernels use bf16 GEMMs)
    ref = reference_forward(params, x, alpha, steps)
    err = float(jnp.max(jnp.abs(out - ref)))
    assert err < 0.15, f"kernel vs reference mismatch: {err}"

    print("KERNEL_OK")
</pallas_src>

<mosaic_0001>
module attributes {stable_mosaic.version = 11 : i64} {
  func.func @_initial_kernel(%arg0: memref<2x32xf32, #tpu.memory_space<vmem>>, %arg1: memref<32x512xbf16, #tpu.memory_space<vmem>>, %arg2: memref<1x512xf32, #tpu.memory_space<vmem>>, %arg3: memref<2x512xbf16, #tpu.memory_space<vmem>>) attributes {dimension_semantics = [], scalar_prefetch = 0 : i64, scratch_operands = 0 : i64, tpu.core_type = #tpu.core_type<tc>} {
    %c0 = arith.constant 0 : index
    %c0_0 = arith.constant 0 : index
    %0 = vector.load %arg0[%c0, %c0_0] : memref<2x32xf32, #tpu.memory_space<vmem>>, vector<2x32xf32>
    %1 = arith.mulf %0, %0 : vector<2x32xf32>
    %cst = arith.constant dense<0.000000e+00> : vector<2xf32>
    %2 = vector.multi_reduction <add>, %1, %cst [1] : vector<2x32xf32> to vector<2xf32>
    %3 = vector.shape_cast %2 : vector<2xf32> to vector<2x1xf32>
    %cst_1 = arith.constant 3.200000e+01 : f32
    %4 = vector.broadcast %cst_1 : f32 to vector<2x1xf32>
    %5 = arith.divf %3, %4 : vector<2x1xf32>
    %cst_2 = arith.constant 9.99999993E-9 : f32
    %6 = vector.broadcast %cst_2 : f32 to vector<2x1xf32>
    %7 = arith.addf %5, %6 : vector<2x1xf32>
    %8 = math.rsqrt %7 : vector<2x1xf32>
    %9 = vector.broadcast %8 : vector<2x1xf32> to vector<2x32xf32>
    %10 = arith.mulf %0, %9 : vector<2x32xf32>
    %11 = arith.truncf %10 : vector<2x32xf32> to vector<2x32xbf16>
    %c0_3 = arith.constant 0 : index
    %c0_4 = arith.constant 0 : index
    %12 = vector.load %arg1[%c0_3, %c0_4] : memref<32x512xbf16, #tpu.memory_space<vmem>>, vector<32x512xbf16>
    %cst_5 = arith.constant dense<0.000000e+00> : vector<2x512xf32>
    %13 = tpu.matmul %11, %12, %cst_5 {dimension_numbers = #tpu.dot_dimension_numbers<[1], [0], [0], [1], [0, 0, 1, 1], [], []>} : vector<2x32xbf16>, vector<32x512xbf16>, vector<2x512xf32> -> vector<2x512xf32>
    %c0_6 = arith.constant 0 : index
    %c0_7 = arith.constant 0 : index
    %14 = vector.load %arg2[%c0_6, %c0_7] : memref<1x512xf32, #tpu.memory_space<vmem>>, vector<1x512xf32>
    %15 = vector.broadcast %14 : vector<1x512xf32> to vector<2x512xf32>
    %16 = arith.addf %13, %15 : vector<2x512xf32>
    %cst_8 = arith.constant 0.000000e+00 : f32
    %17 = vector.broadcast %cst_8 : f32 to vector<2x512xf32>
    %18 = arith.cmpf oge, %16, %17 : vector<2x512xf32>
    %cst_9 = arith.constant 2.000000e-01 : f32
    %19 = vector.broadcast %cst_9 : f32 to vector<2x512xf32>
    %20 = arith.mulf %19, %16 : vector<2x512xf32>
    %21 = arith.select %18, %16, %20 : vector<2x512xi1>, vector<2x512xf32>
    %22 = arith.truncf %21 : vector<2x512xf32> to vector<2x512xbf16>
    %c0_10 = arith.constant 0 : index
    %c0_11 = arith.constant 0 : index
    %23 = vector.load %arg3[%c0_10, %c0_11] : memref<2x512xbf16, #tpu.memory_space<vmem>>, vector<2x512xbf16>
    tpu.vector_store %arg3[%c0_10, %c0_11], %22 {strides = array<i32>} : memref<2x512xbf16, #tpu.memory_space<vmem>>, vector<2x512xbf16>,
    return
  }
}

</mosaic_0001>

<bundles_post_ra>
// kernel: tpu_custom_call.1
= control target key start
LH: loop header
LB: loop body
LE: loop exit
PB: predicated region body
PF: predicated region fallthrough
CT: control target
= control target key end

     0   :  { %8 = vsyncpa [#allocation3], 0  ;;  %s451_s0 = inlined_call_operand.hbm [shape: f32[2,32], index: 0, kind: input, shape index: {}]   ;;  %s452_s1 = inlined_call_operand.hbm [shape: bf16[32,512], index: 1, kind: input, shape index: {}]   ;;  %s453_s2 = inlined_call_operand.vmem [shape: f32[1,512], index: 2, kind: input, shape index: {}]   ;;  %s454_s3 = inlined_call_operand.hbm [shape: bf16[2,512], index: 3, kind: output, shape index: {}]  }
   0x1   :  { %9 = vsyncpa [#allocation6], 0 }
   0x2   :  { %10 = vsyncpa [#allocation4], 0  ;;  %s378_s12 = smov [#allocation2]   ;;  %s379_s14 = smov [#allocation5]  }
   0x3   :  { %s17_s13 = sshll.u32 %s378_s12, 4  ;;  %s26_s15 = sshll.u32 %s379_s14, 4  ;;  %s18_s13 = int_to_ptr.vmem [resolvable:$true] %s17_s13  ;;  %s405_s15 = int_to_ptr.vmem [resolvable:$true] %s26_s15 }
   0x4   :  { %s306_s18 = scalar_lea.hbm %s451_s0, 32 }
   0x5   :  { %p307_p0 = scmp.ne.s32.totalorder %s451_s0, %s306_s18  ;;  %p310_p1 = scmp.lt.u32.totalorder %s306_s18, %s451_s0 }
   0x7   :  { %p312_p2 = pnand %p310_p1, %p307_p0 }
   0x9   :  { %315 = shalt.err (!%p312_p2)
}
   0xa   :  { %s316_s23 = scalar_lea.vmem %s18_s13, 32  ;;  %p321_p4 = scmp.lt.s32.totalorder %s18_s13, %s18_s13 }
   0xb   :  { %p317_p3 = scmp.ne.s32.totalorder %s18_s13, %s316_s23  ;;  %p322_p5 = scmp.lt.s32.totalorder %s316_s23, %s316_s23 }
   0xd   :  { %p323_p6 = por %p322_p5, %p321_p4 }
   0xf   :  { %p324_p7 = pnand %p323_p6, %p317_p3 }
  0x11   :  { %327 = shalt.err (!%p324_p7)
}
  0x12   :  { %20 = dma.hbm_to_vmem [thread:$0]  %s451_s0, 32, %s18_s13, [#allocation3]  }
  0x13   :  { %s328_s28 = scalar_lea.hbm %s452_s1, 1024 }
  0x14   :  { %p329_p8 = scmp.ne.s32.totalorder %s452_s1, %s328_s28  ;;  %p332_p9 = scmp.lt.u32.totalorder %s328_s28, %s452_s1 }
  0x16   :  { %p334_p10 = pnand %p332_p9, %p329_p8 }
  0x18   :  { %337 = shalt.err (!%p334_p10)
}
  0x19   :  { %s338_s6 = scalar_lea.vmem %s405_s15, 1024  ;;  %p343_p12 = scmp.lt.s32.totalorder %s405_s15, %s405_s15 }
  0x1a   :  { %p339_p11 = scmp.ne.s32.totalorder %s405_s15, %s338_s6  ;;  %p344_p13 = scmp.lt.s32.totalorder %s338_s6, %s338_s6 }
  0x1c   :  { %p345_p0 = por %p344_p13, %p343_p12 }
  0x1e   :  { %p346_p1 = pnand %p345_p0, %p339_p11 }
  0x20   :  { %349 = shalt.err (!%p346_p1)
}
  0x21   :  { %s380_s0 = smov 256   ;;  %s381_s7 = smov 16  }
  0x22   :  { %32 = dma.hbm_to_vmem [thread:$0]  %s452_s1, 1024, %s405_s15, [#allocation6], %s380_s0, %s380_s0, %s381_s7  }
  0x23   :  { %372 = dma.done.wait [#allocation3], 32  }
  0x24   :  { %373 = vsyncadd [#allocation3], 4294967264 }
  0x25   :  { %374 = dma.done.wait [#allocation6], 1024  }
  0x26   :  { %375 = vsyncadd [#allocation6], 4294966272  ;;  %v42_v0 = vld [vmem:[#allocation2] sm:$0x3]  ;;  %vm44_vm0 = vcmask 254976   ;;  %v382_v11 = vmov 0   ;;  %v64_v18 = vlaneseq }
  0x27   :  { %v43_v1 = vmul.f32 %v42_v0, %v42_v0  ;;  %v292_v3 = vld [vmem:[#allocation5 + $0x4] ss:$16 sps:$4 sm:$0xff]   ;;  %v294_v4 = vld [vmem:[#allocation5 + $0xc] ss:$16 sps:$4 sm:$0xff]   ;;  %v296_v5 = vld [vmem:[#allocation5] ss:$16 sps:$4 sm:$0xff]   ;;  %160 = vmatprep.mubr.bf16.mxu0 %v382_v11  ;;  %201 = vmatprep.mubr.bf16.mxu1 %v382_v11 }
  0x28   :  { %v297_v6 = vld [vmem:[#allocation5 + $0x8] ss:$16 sps:$4 sm:$0xff]   ;;  %v298_v7 = vld [vmem:[#allocation5 + $0x24] ss:$16 sps:$4 sm:$0xff]   ;;  %v300_v8 = vld [vmem:[#allocation5 + $0x2c] ss:$16 sps:$4 sm:$0xff]   ;;  %128 = vmatprep.subr.bf16.mxu0 %v292_v3  ;;  %169 = vmatprep.subr.bf16.mxu1 %v294_v4 }
  0x29   :  { %v45_v2 = vsel %vm44_vm0, %v43_v1, 0.0  ;;  %129 = vmatpush1.bf16.msra.mxu0 %v296_v5  ;;  %170 = vmatpush1.bf16.msra.mxu1 %v297_v6  ;;  %v302_v9 = vld [vmem:[#allocation5 + $0x20] ss:$16 sps:$4 sm:$0xff]   ;;  %v303_v10 = vld [vmem:[#allocation5 + $0x28] ss:$16 sps:$4 sm:$0xff]   ;;  %vm124_vm1 = vcmask 261120  }
  0x2a   :  { %46 = vadd.xlane.f32.xlu0 %v45_v2  ;;  %130 = vmatprep.subr.bf16.mxu0 %v298_v7  ;;  %v65_v19 = vshrl.u32 %v64_v18, 7  ;;  %v62_v22 = vld [vmem:[%s453_s2] sm:$0xf]  ;;  %v383_v27 = vmov 1966171168   ;;  %s384_s2 = smov [#allocation7]  }
  0x2b   :  { %171 = vmatprep.subr.bf16.mxu1 %v300_v8  ;;  %v233_v28 = vunpack.c.l.s4 %v383_v27  ;;  %s262_s11 = sshll.u32 %s384_s2, 4  ;;  %s263_s11 = int_to_ptr.vmem [resolvable:$true] %s262_s11 }
  0x2c   :  { %v66_v20 = vsub.s32 0, %v65_v19  ;;  %v74_v21 = vsub.s32 2, %v65_v19  ;;  %v70_v23 = vsub.s32 1, %v65_v19  ;;  %v78_v24 = vsub.s32 3, %v65_v19  ;;  %s350_s12 = scalar_lea.vmem %s263_s11, 64  ;;  %p355_p3 = scmp.lt.s32.totalorder %s263_s11, %s263_s11 }
  0x2d   :  { %131 = vmatpush1.bf16.msra.mxu0 %v302_v9  ;;  %172 = vmatpush1.bf16.msra.mxu1 %v303_v10  ;;  %v234_v37 = vunpack.c.0.s8 %v233_v28  ;;  %p351_p2 = scmp.ne.s32.totalorder %s263_s11, %s350_s12  ;;  %p356_p4 = scmp.lt.s32.totalorder %s350_s12, %s350_s12 }
  0x2e   :  { %v67_v25 = vrot.slane %v62_v22, %v66_v20  ;;  %v75_v26 = vrot.slane %v62_v22, %v74_v21  ;;  %v71_v29 = vrot.slane %v62_v22, %v70_v23  ;;  %v79_v30 = vrot.slane %v62_v22, %v78_v24 }
  0x2f   :  { %v237_v50 = vsub.s32 %v234_v37, %v65_v19  ;;  %p357_p5 = por %p356_p4, %p355_p3 }
  0x31   :  { %p358_p6 = pnand %p357_p5, %p351_p2 }
  0xb7   :  { %v47_v12 = vpop.xlane.xlu0 %46 }
  0xb8   :  { %v49_v13 = vmul.f32 0.03125, %v47_v12 }
  0xba   :  { %v50_v14 = vadd.f32 1e-08, %v49_v13 }
  0xbc   :  { %304 = vrsqrt.f32 %v50_v14 }
  0xc6   :  { %v305_v15 = vpop.eup %304 }
  0xc7   :  { %v52_v16 = vmul.f32 %v305_v15, %v42_v0 }
  0xc9   :  { %v53_v17 = vpack.c.bf16 %v52_v16, %v52_v16 }
  0xcb   :  { %280 = vmatmul.mubr.msk.bf16.vlgmr.msra.gmra.mrb[0].mxu0 %vm124_vm1, %v53_v17  ;;  %281 = vmatmul.mubr.msk.bf16.vlgmr.msra.gmra.mrb[0].mxu1 %vm124_vm1, %v53_v17 }
 0x19e   :  { %v162_v31 = vpop.f32.mrb[0].mxu0  ;;  %v203_v32 = vpop.f32.mrb[0].mxu1 }
 0x19f   :  { %v163_v33 = vadd.f32 %v162_v31, %v67_v25  ;;  %v204_v34 = vadd.f32 %v203_v32, %v75_v26  ;;  %v164_v35 = vpop.f32.mrb[1].mxu0  ;;  %v205_v36 = vpop.f32.mrb[1].mxu1 }
 0x1a0   :  { %v165_v38 = vadd.f32 %v164_v35, %v71_v29  ;;  %v206_v39 = vadd.f32 %v205_v36, %v79_v30  ;;  %v166_v40 = vpop.f32.mrb[2].mxu0  ;;  %v207_v41 = vpop.f32.mrb[2].mxu1 }
 0x1a1   :  { %vm210_vm2 = vcmp.ge.f32.partialorder %v163_v33, 0.0  ;;  %v214_v42 = vmul.f32 0.2, %v163_v33  ;;  %vm212_vm3 = vcmp.ge.f32.partialorder %v204_v34, 0.0  ;;  %v216_v43 = vmul.f32 0.2, %v204_v34 }
 0x1a2   :  { %vm211_vm4 = vcmp.ge.f32.partialorder %v165_v38, 0.0  ;;  %v215_v44 = vmul.f32 0.2, %v165_v38  ;;  %vm213_vm5 = vcmp.ge.f32.partialorder %v206_v39, 0.0  ;;  %v217_v45 = vmul.f32 0.2, %v206_v39 }
 0x1a3   :  { %v218_v46 = vsel %vm210_vm2, %v163_v33, %v214_v42  ;;  %v220_v47 = vsel %vm212_vm3, %v204_v34, %v216_v43  ;;  %v167_v48 = vpop.f32.mrb[3].mxu0  ;;  %v208_v49 = vpop.f32.mrb[3].mxu1 }
 0x1a4   :  { %v219_v51 = vsel %vm211_vm4, %v165_v38, %v215_v44  ;;  %v221_v52 = vsel %vm213_vm5, %v206_v39, %v217_v45 }
 0x1a5   :  { %v282_v53 = vpack.c.bf16 %v219_v51, %v218_v46  ;;  %v283_v54 = vpack.c.bf16 %v221_v52, %v220_v47 }
 0x1a7   :  { %v238_v55 = vrot.slane %v282_v53, %v237_v50  ;;  %v245_v56 = vrot.slane %v283_v54, %v237_v50 }
 0x1a9   :  { %v246_v57 = vcombine.low %v238_v55, %v245_v56 }
 0x1ab   :  { %284 = vst.sshfl [vmem:[#allocation7] sm:$0x55 pattern:$0x73625140] %v246_v57 }
 0x1ac   :  { %361 = shalt.err (!%p358_p6)
}
 0x1ad   :  { %s362_s15 = scalar_lea.hbm %s454_s3, 64 }
 0x1ae   :  { %p363_p7 = scmp.ne.s32.totalorder %s454_s3, %s362_s15  ;;  %p366_p8 = scmp.lt.u32.totalorder %s362_s15, %s454_s3 }
 0x1b0   :  { %p368_p9 = pnand %p366_p8, %p363_p7 }
 0x1b2   :  { %371 = shalt.err (!%p368_p9)
}
 0x1b3   :  { %265 = dma.vmem_to_hbm [thread:$0]  %s263_s11, 64, %s454_s3, [#allocation4]  }
 0x1b4   :  { %376 = dma.done.wait [#allocation4], 64  }
 0x1b5   :  { %377 = vsyncadd [#allocation4], 4294967232 }
 0x1b6   :  { %269 = vsyncpa [#allocation3], 1 }
 0x1b7   :  { %270 = vsyncpa [#allocation6], 1 }
 0x1b8   :  { %271 = vsyncpa [#allocation4], 1 }

</bundles_post_ra>
